<compile_context>
chip_gen: v7x
topology: tpu7x:2x2x1
jax: 0.10.0
libtpu: 0.0.40
codegen_flags: <defaults>
</compile_context>

<pallas_src>
import functools

import jax
import jax.numpy as jnp
from jax import lax
from jax.experimental import pallas as pl
from jax.experimental.pallas import tpu as pltpu

_LANE = 128           # lane width (last dim)
_BLOCK_ROWS = 2048    # sublane rows per grid step (1 MiB f32 per input block)
_NUM_SLICES = 2       # leading "parallel" axis (v7x has 2 TensorCores)


def _dice_kernel(p_ref, t_ref, out_ref, acc_pt_ref, acc_sum_ref, *,
                 rows, block_rows, blocks_per_slice):
    """Per-slice partial sums of (pred*target) and (pred+target)."""
    c = pl.program_id(0)          # slice (core) index   -- "parallel"
    i = pl.program_id(1)          # block within slice   -- "arbitrary"

    @pl.when(i == 0)
    def _():
        acc_pt_ref[...] = jnp.zeros_like(acc_pt_ref)
        acc_sum_ref[...] = jnp.zeros_like(acc_sum_ref)

    p = p_ref[...].astype(jnp.float32)
    t = t_ref[...].astype(jnp.float32)

    # Mask rows past the end of the data (ragged last block / clamped blocks).
    logical_block = c * blocks_per_slice + i
    valid_rows = rows - logical_block * block_rows   # may be <= 0 or >= block_rows
    row_ids = lax.broadcasted_iota(jnp.int32, (block_rows, 1), 0)
    mask = row_ids < valid_rows
    p = jnp.where(mask, p, 0.0)
    t = jnp.where(mask, t, 0.0)

    # Pure-VPU elementwise accumulation (free filler under an HBM-bound roofline).
    acc_pt_ref[...] += p * t
    acc_sum_ref[...] += p + t

    # Single cross-lane reduction at the end of this slice's reduction axis.
    @pl.when(i == pl.num_programs(1) - 1)
    def _():
        out_ref[0, 0] = jnp.sum(acc_pt_ref[...])
        out_ref[0, 1] = jnp.sum(acc_sum_ref[...])


def dice_smooth_loss(pred_seg, target_seg, epsilon=1e-9,
                     block_rows=_BLOCK_ROWS, num_slices=_NUM_SLICES):
    """Pallas implementation of DICE_Smotth_Loss.forward. Returns a scalar f32."""
    assert pred_seg.shape == target_seg.shape

    p_flat = pred_seg.reshape(-1)
    t_flat = target_seg.reshape(-1)
    n = p_flat.shape[0]

    # Lane-align only if needed (zero pad leaves all three sums unchanged).
    # For the common case numel % 128 == 0 this is a pure reshape -> no copy.
    rem = n % _LANE
    if rem:
        pad = _LANE - rem
        p_flat = jnp.pad(p_flat, (0, pad))
        t_flat = jnp.pad(t_flat, (0, pad))

    rows = p_flat.shape[0] // _LANE
    p2 = p_flat.reshape(rows, _LANE)
    t2 = t_flat.reshape(rows, _LANE)

    # Block sizing: big blocks for large inputs; shrink (multiple of 8
    # sublanes) for small ones so we don't over-allocate VMEM.
    block_rows = min(block_rows, -(-rows // 8) * 8)
    total_blocks = -(-rows // block_rows)
    num_slices = max(1, min(num_slices, total_blocks))
    blocks_per_slice = -(-total_blocks // num_slices)

    def in_map(c, i):
        # Clamp fully out-of-range logical blocks onto the last real block;
        # the in-kernel row mask zeroes their contribution.
        return (jnp.minimum(c * blocks_per_slice + i, total_blocks - 1), 0)

    kernel = functools.partial(
        _dice_kernel, rows=rows, block_rows=block_rows,
        blocks_per_slice=blocks_per_slice)

    partials = pl.pallas_call(
        kernel,
        out_shape=jax.ShapeDtypeStruct((num_slices, 2), jnp.float32),
        grid_spec=pltpu.PrefetchScalarGridSpec(
            num_scalar_prefetch=0,
            grid=(num_slices, blocks_per_slice),
            in_specs=[
                pl.BlockSpec((block_rows, _LANE), in_map),
                pl.BlockSpec((block_rows, _LANE), in_map),
            ],
            out_specs=pl.BlockSpec((1, 2), lambda c, i: (c, 0),
                                   memory_space=pltpu.SMEM),
            scratch_shapes=[
                pltpu.VMEM((block_rows, _LANE), jnp.float32),
                pltpu.VMEM((block_rows, _LANE), jnp.float32),
            ],
        ),
        compiler_params=pltpu.CompilerParams(
            dimension_semantics=("parallel", "arbitrary"),
        ),
    )(p2, t2)

    sum_pt = jnp.sum(partials[:, 0])       # sum(pred * target)
    sum_total = jnp.sum(partials[:, 1])    # sum(pred) + sum(target)
    eps = jnp.float32(epsilon)
    return 1.0 - (2.0 * sum_pt + eps) / (sum_total + eps)


def dice_smooth_loss_ref(pred_seg, target_seg, epsilon=1e-9):
    """Pure-JAX reference mirroring the PyTorch forward."""
    num = jnp.sum(2.0 * pred_seg * target_seg) + epsilon
    den = jnp.sum(pred_seg) + jnp.sum(target_seg) + epsilon
    return 1.0 - num / den


if __name__ == "__main__":
    key = jax.random.PRNGKey(0)
    k1, k2 = jax.random.split(key)

    # pred_seg: soft segmentation probabilities, target_seg: binary mask
    pred_seg = jax.random.uniform(k1, (2, 4, 16, 16), dtype=jnp.float32)
    target_seg = (
        jax.random.uniform(k2, (2, 4, 16, 16), dtype=jnp.float32) > 0.5
    ).astype(jnp.float32)

    loss = jax.block_until_ready(dice_smooth_loss(pred_seg, target_seg))
    ref = jax.block_until_ready(dice_smooth_loss_ref(pred_seg, target_seg))
    assert jnp.allclose(loss, ref, rtol=1e-5, atol=1e-6), (loss, ref)

    print("KERNEL_OK")
</pallas_src>

<mosaic_0001>
module attributes {stable_mosaic.version = 11 : i64} {
  func.func @_dice_kernel(%arg0: i32, %arg1: i32, %arg2: memref<16x128xf32, #tpu.memory_space<vmem>>, %arg3: memref<16x128xf32, #tpu.memory_space<vmem>>, %arg4: memref<1x2xf32, #tpu.memory_space<smem>>, %arg5: memref<16x128xf32, #tpu.memory_space<vmem>>, %arg6: memref<16x128xf32, #tpu.memory_space<vmem>>) attributes {dimension_semantics = [#tpu.dimension_semantics<parallel>, #tpu.dimension_semantics<arbitrary>], iteration_bounds = array<i64: 1, 1>, scalar_prefetch = 0 : i64, scratch_operands = 2 : i64, tpu.core_type = #tpu.core_type<tc>, window_params = [{transform_indices = @transform_0, window_bounds = array<i64: 16, 128>}, {transform_indices = @transform_1, window_bounds = array<i64: 16, 128>}, {transform_indices = @transform_2, window_bounds = array<i64: 1, 2>}]} {
    %c0_i32 = arith.constant 0 : i32
    %0 = arith.cmpi eq, %arg1, %c0_i32 : i32
    %1 = arith.extui %0 : i1 to i32
    %c0_i32_0 = arith.constant 0 : i32
    %2 = arith.cmpi ne, %1, %c0_i32_0 : i32
    scf.if %2 {
      %cst_16 = arith.constant 0.000000e+00 : f32
      %31 = vector.broadcast %cst_16 : f32 to vector<16x128xf32>
      %c0_17 = arith.constant 0 : index
      %c0_18 = arith.constant 0 : index
      %32 = vector.load %arg5[%c0_17, %c0_18] : memref<16x128xf32, #tpu.memory_space<vmem>>, vector<16x128xf32>
      tpu.vector_store %arg5[%c0_17, %c0_18], %31 {strides = array<i32>} : memref<16x128xf32, #tpu.memory_space<vmem>>, vector<16x128xf32>,
      %cst_19 = arith.constant 0.000000e+00 : f32
      %33 = vector.broadcast %cst_19 : f32 to vector<16x128xf32>
      %c0_20 = arith.constant 0 : index
      %c0_21 = arith.constant 0 : index
      %34 = vector.load %arg6[%c0_20, %c0_21] : memref<16x128xf32, #tpu.memory_space<vmem>>, vector<16x128xf32>
      tpu.vector_store %arg6[%c0_20, %c0_21], %33 {strides = array<i32>} : memref<16x128xf32, #tpu.memory_space<vmem>>, vector<16x128xf32>,
    } else {
    }
    %c0 = arith.constant 0 : index
    %c0_1 = arith.constant 0 : index
    %3 = vector.load %arg2[%c0, %c0_1] : memref<16x128xf32, #tpu.memory_space<vmem>>, vector<16x128xf32>
    %c0_2 = arith.constant 0 : index
    %c0_3 = arith.constant 0 : index
    %4 = vector.load %arg3[%c0_2, %c0_3] : memref<16x128xf32, #tpu.memory_space<vmem>>, vector<16x128xf32>
    %c1_i32 = arith.constant 1 : i32
    %5 = arith.muli %arg0, %c1_i32 : i32
    %6 = arith.addi %5, %arg1 : i32
    %c16_i32 = arith.constant 16 : i32
    %7 = arith.muli %6, %c16_i32 : i32
    %c16_i32_4 = arith.constant 16 : i32
    %8 = arith.subi %c16_i32_4, %7 : i32
    %9 = tpu.iota {dimensions = array<i32: 0>} : vector<16x1xi32>
    %10 = vector.broadcast %8 : i32 to vector<16x1xi32>
    %11 = arith.cmpi slt, %9, %10 : vector<16x1xi32>
    %cst = arith.constant 0.000000e+00 : f32
    %12 = vector.shape_cast %11 : vector<16x1xi1> to vector<16x1xi1>
    %13 = vector.broadcast %12 : vector<16x1xi1> to vector<16x128xi1>
    %14 = vector.broadcast %cst : f32 to vector<16x128xf32>
    %15 = arith.select %13, %3, %14 : vector<16x128xi1>, vector<16x128xf32>
    %cst_5 = arith.constant 0.000000e+00 : f32
    %16 = vector.shape_cast %11 : vector<16x1xi1> to vector<16x1xi1>
    %17 = vector.broadcast %16 : vector<16x1xi1> to vector<16x128xi1>
    %18 = vector.broadcast %cst_5 : f32 to vector<16x128xf32>
    %19 = arith.select %17, %4, %18 : vector<16x128xi1>, vector<16x128xf32>
    %c0_6 = arith.constant 0 : index
    %c0_7 = arith.constant 0 : index
    %20 = vector.load %arg5[%c0_6, %c0_7] : memref<16x128xf32, #tpu.memory_space<vmem>>, vector<16x128xf32>
    %21 = arith.mulf %15, %19 : vector<16x128xf32>
    %22 = arith.addf %20, %21 : vector<16x128xf32>
    %c0_8 = arith.constant 0 : index
    %c0_9 = arith.constant 0 : index
    %23 = vector.load %arg5[%c0_8, %c0_9] : memref<16x128xf32, #tpu.memory_space<vmem>>, vector<16x128xf32>
    tpu.vector_store %arg5[%c0_8, %c0_9], %22 {strides = array<i32>} : memref<16x128xf32, #tpu.memory_space<vmem>>, vector<16x128xf32>,
    %c0_10 = arith.constant 0 : index
    %c0_11 = arith.constant 0 : index
    %24 = vector.load %arg6[%c0_10, %c0_11] : memref<16x128xf32, #tpu.memory_space<vmem>>, vector<16x128xf32>
    %25 = arith.addf %15, %19 : vector<16x128xf32>
    %26 = arith.addf %24, %25 : vector<16x128xf32>
    %c0_12 = arith.constant 0 : index
    %c0_13 = arith.constant 0 : index
    %27 = vector.load %arg6[%c0_12, %c0_13] : memref<16x128xf32, #tpu.memory_space<vmem>>, vector<16x128xf32>
    tpu.vector_store %arg6[%c0_12, %c0_13], %26 {strides = array<i32>} : memref<16x128xf32, #tpu.memory_space<vmem>>, vector<16x128xf32>,
    %c0_i32_14 = arith.constant 0 : i32
    %28 = arith.cmpi eq, %arg1, %c0_i32_14 : i32
    %29 = arith.extui %28 : i1 to i32
    %c0_i32_15 = arith.constant 0 : i32
    %30 = arith.cmpi ne, %29, %c0_i32_15 : i32
    scf.if %30 {
      %c0_16 = arith.constant 0 : index
      %c0_17 = arith.constant 0 : index
      %31 = vector.load %arg5[%c0_16, %c0_17] : memref<16x128xf32, #tpu.memory_space<vmem>>, vector<16x128xf32>
      %32 = vector.shape_cast %31 : vector<16x128xf32> to vector<1x16x128xf32>
      %cst_18 = arith.constant dense<0.000000e+00> : vector<1xf32>
      %33 = vector.multi_reduction <add>, %32, %cst_18 [1, 2] : vector<1x16x128xf32> to vector<1xf32>
      %34 = vector.shape_cast %33 : vector<1xf32> to vector<1x1x1xf32>
      %35 = vector.extract %34[0, 0, 0] : f32 from vector<1x1x1xf32>
      %c0_19 = arith.constant 0 : index
      %c0_20 = arith.constant 0 : index
      %36 = memref.load %arg4[%c0_19, %c0_20] : memref<1x2xf32, #tpu.memory_space<smem>>
      memref.store %35, %arg4[%c0_19, %c0_20] : memref<1x2xf32, #tpu.memory_space<smem>>
      %c0_21 = arith.constant 0 : index
      %c0_22 = arith.constant 0 : index
      %37 = vector.load %arg6[%c0_21, %c0_22] : memref<16x128xf32, #tpu.memory_space<vmem>>, vector<16x128xf32>
      %38 = vector.shape_cast %37 : vector<16x128xf32> to vector<1x16x128xf32>
      %cst_23 = arith.constant dense<0.000000e+00> : vector<1xf32>
      %39 = vector.multi_reduction <add>, %38, %cst_23 [1, 2] : vector<1x16x128xf32> to vector<1xf32>
      %40 = vector.shape_cast %39 : vector<1xf32> to vector<1x1x1xf32>
      %41 = vector.extract %40[0, 0, 0] : f32 from vector<1x1x1xf32>
      %c0_24 = arith.constant 0 : index
      %c1 = arith.constant 1 : index
      %42 = memref.load %arg4[%c0_24, %c1] : memref<1x2xf32, #tpu.memory_space<smem>>
      memref.store %41, %arg4[%c0_24, %c1] : memref<1x2xf32, #tpu.memory_space<smem>>
    } else {
    }
    return
  }
  func.func @transform_0(%arg0: i32, %arg1: i32) -> (i32, i32) {
    %c1_i32 = arith.constant 1 : i32
    %0 = arith.muli %arg0, %c1_i32 : i32
    %1 = arith.addi %0, %arg1 : i32
    %c0_i32 = arith.constant 0 : i32
    %2 = arith.minsi %1, %c0_i32 : i32
    %c0_i32_0 = arith.constant 0 : i32
    %c0_i32_1 = arith.constant 0 : i32
    return %2, %c0_i32_0 : i32, i32
  }
  func.func @transform_1(%arg0: i32, %arg1: i32) -> (i32, i32) {
    %c1_i32 = arith.constant 1 : i32
    %0 = arith.muli %arg0, %c1_i32 : i32
    %1 = arith.addi %0, %arg1 : i32
    %c0_i32 = arith.constant 0 : i32
    %2 = arith.minsi %1, %c0_i32 : i32
    %c0_i32_0 = arith.constant 0 : i32
    %c0_i32_1 = arith.constant 0 : i32
    return %2, %c0_i32_0 : i32, i32
  }
  func.func @transform_2(%arg0: i32, %arg1: i32) -> (i32, i32) {
    %c0_i32 = arith.constant 0 : i32
    %c0_i32_0 = arith.constant 0 : i32
    return %arg0, %c0_i32 : i32, i32
  }
}

</mosaic_0001>

<bundles_post_ra>
// kernel: tpu_custom_call.1
= control target key start
LH: loop header
LB: loop body
LE: loop exit
PB: predicated region body
PF: predicated region fallthrough
CT: control target
= control target key end

     0   :  { %7 = vsyncpa [#allocation5], 0  ;;  %s280_s0 = inlined_call_operand.hbm [shape: f32[16,128], index: 0, kind: input, shape index: {}]   ;;  %s281_s1 = inlined_call_operand.hbm [shape: f32[16,128], index: 1, kind: input, shape index: {}]   ;;  %s282_s2 = inlined_call_operand.hbm [shape: f32[1,2], index: 2, kind: output, shape index: {}]  }
   0x1   :  { %8 = vsyncpa [#allocation8], 0 }
   0x2   :  { %9 = vsyncpa [#allocation6], 0  ;;  %s224_s9 = smov [#allocation4]   ;;  %s164_s13 = scalar_lea.hbm %s280_s0, 256 }
   0x3   :  { %s21_s10 = sshll.u32 %s224_s9, 4  ;;  %p165_p0 = scmp.ne.s32.totalorder %s280_s0, %s164_s13  ;;  %s22_s10 = int_to_ptr.vmem [resolvable:$true] %s21_s10 }
   0x4   :  { %p168_p1 = scmp.lt.u32.totalorder %s164_s13, %s280_s0 }
   0x6   :  { %p170_p2 = pnand %p168_p1, %p165_p0 }
   0x8   :  { %173 = shalt.err (!%p170_p2)
}
   0x9   :  { %s174_s18 = scalar_lea.vmem %s22_s10, 256  ;;  %p179_p4 = scmp.lt.s32.totalorder %s22_s10, %s22_s10 }
   0xa   :  { %p175_p3 = scmp.ne.s32.totalorder %s22_s10, %s174_s18  ;;  %p180_p5 = scmp.lt.s32.totalorder %s174_s18, %s174_s18 }
   0xc   :  { %p181_p6 = por %p180_p5, %p179_p4 }
   0xe   :  { %p182_p7 = pnand %p181_p6, %p175_p3 }
  0x10   :  { %185 = shalt.err (!%p182_p7)
}
  0x11   :  { %s225_s19 = smov 128   ;;  %s226_s20 = smov 8  }
  0x12   :  { %27 = dma.hbm_to_vmem [thread:$0]  %s280_s0, 256, %s22_s10, [#allocation5], %s225_s19, %s225_s19, %s226_s20  }
  0x13   :  { %s227_s23 = smov [#allocation7]   ;;  %s186_s27 = scalar_lea.hbm %s281_s1, 256 }
  0x14   :  { %s39_s24 = sshll.u32 %s227_s23, 4  ;;  %p187_p8 = scmp.ne.s32.totalorder %s281_s1, %s186_s27  ;;  %s40_s24 = int_to_ptr.vmem [resolvable:$true] %s39_s24 }
  0x15   :  { %p190_p9 = scmp.lt.u32.totalorder %s186_s27, %s281_s1 }
  0x17   :  { %p192_p10 = pnand %p190_p9, %p187_p8 }
  0x19   :  { %195 = shalt.err (!%p192_p10)
}
  0x1a   :  { %s196_s4 = scalar_lea.vmem %s40_s24, 256  ;;  %p201_p12 = scmp.lt.s32.totalorder %s40_s24, %s40_s24 }
  0x1b   :  { %p197_p11 = scmp.ne.s32.totalorder %s40_s24, %s196_s4  ;;  %p202_p13 = scmp.lt.s32.totalorder %s196_s4, %s196_s4 }
  0x1d   :  { %p203_p0 = por %p202_p13, %p201_p12 }
  0x1f   :  { %p204_p1 = pnand %p203_p0, %p197_p11 }
  0x21   :  { %207 = shalt.err (!%p204_p1)
}
  0x22   :  { %45 = dma.hbm_to_vmem [thread:$0]  %s281_s1, 256, %s40_s24, [#allocation8], %s225_s19, %s225_s19, %s226_s20  }
  0x23   :  { %218 = dma.done.wait [#allocation5], 256  }
  0x24   :  { %219 = vsyncadd [#allocation5], 4294967040 }
  0x25   :  { %220 = dma.done.wait [#allocation8], 256  }
  0x26   :  { %221 = vsyncadd [#allocation8], 4294967040  ;;  %v68_v0 = vld [vmem:[#allocation4] sm:$0xff]  ;;  %v69_v1 = vld [vmem:[#allocation4 + $0x8] sm:$0xff]  ;;  %s208_s9 = scalar_lea.hbm %s282_s2, 16 }
  0x27   :  { %v70_v2 = vld [vmem:[#allocation7] sm:$0xff]  ;;  %v71_v3 = vld [vmem:[#allocation7 + $0x8] sm:$0xff]  ;;  %p209_p2 = scmp.ne.s32.totalorder %s282_s2, %s208_s9  ;;  %p212_p3 = scmp.lt.u32.totalorder %s208_s9, %s282_s2 }
  0x28   :  { %v91_v4 = vmul.f32 %v70_v2, %v68_v0  ;;  %v92_v5 = vmul.f32 %v71_v3, %v69_v1  ;;  %v99_v6 = vadd.f32 %v70_v2, %v68_v0  ;;  %v100_v7 = vadd.f32 %v71_v3, %v69_v1 }
  0x29   :  { %p214_p4 = pnand %p212_p3, %p209_p2 }
  0x2a   :  { %v110_v8 = vadd.f32 %v92_v5, %v91_v4  ;;  %v124_v9 = vadd.f32 %v100_v7, %v99_v6 }
  0x2c   :  { %111 = vadd.xlane.f32.xlu0 %v110_v8 }
  0x30   :  { %125 = vadd.xlane.f32.xlu0 %v124_v9 }
  0xb9   :  { %v112_v10 = vpop.xlane.xlu0 %111 }
  0xba   :  { %v113_v11 = vrot.slane %v112_v10, 4 }
  0xbc   :  { %v114_v12 = vadd.f32 %v113_v11, %v112_v10 }
  0xbd   :  { %v126_v13 = vpop.xlane.xlu0 %125 }
  0xbe   :  { %v115_v14 = vrot.slane %v114_v12, 2  ;;  %v127_v15 = vrot.slane %v126_v13, 4 }
  0xc0   :  { %v128_v16 = vadd.f32 %v127_v15, %v126_v13  ;;  %v116_v17 = vadd.f32 %v115_v14, %v114_v12 }
  0xc2   :  { %v129_v18 = vrot.slane %v128_v16, 2  ;;  %v117_v19 = vrot.slane %v116_v17, 1 }
  0xc4   :  { %v130_v20 = vadd.f32 %v129_v18, %v128_v16  ;;  %v118_v21 = vadd.f32 %v117_v19, %v116_v17 }
  0xc6   :  { %155 = vpush %v118_v21  ;;  %v131_v22 = vrot.slane %v130_v20, 1 }
  0xc8   :  { %v132_v23 = vadd.f32 %v131_v22, %v130_v20 }
  0xca   :  { %157 = vpush %v132_v23 }
  0xf7   :  { %s156_s1 = spop %155 }
  0xf8   :  { %121 = sst [smem:[#allocation9]] %s156_s1 }
  0xfb   :  { %s158_s6 = spop %157 }
  0xfc   :  { %135 = sst [smem:[#allocation9 + $0x1]] %s158_s6 }
  0xfd   :  { %217 = shalt.err (!%p214_p4)
}
  0xfe   :  { %s228_s14 = smov [#allocation9]  }
  0xff   :  { %143 = dma.smem_to_hbm %s228_s14, 16, %s282_s2, [#allocation6]  }
 0x100   :  { %222 = dma.done.wait [#allocation6], 16  }
 0x101   :  { %223 = vsyncadd [#allocation6], 4294967280 }
 0x102   :  { %147 = sfence }
 0x103   :  { %148 = vsyncpa [#allocation5], 1 }
 0x104   :  { %149 = vsyncpa [#allocation8], 1 }
 0x105   :  { %150 = vsyncpa [#allocation6], 1 }

</bundles_post_ra>
